<compile_context>
chip_gen: v7x
topology: tpu7x:2x2x1
jax: 0.10.0
libtpu: 0.0.40
codegen_flags: <defaults>
</compile_context>

<pallas_src>
import functools
import math

import jax
import jax.numpy as jnp
from jax import lax
from jax.experimental import pallas as pl
from jax.experimental.pallas import tpu as pltpu

_SUBLANE = 8    # f32 sublane granularity
_LANE = 128     # lane granularity


# ----------------------------- small helpers ------------------------------ #

def _ceil_to(x, m):
    return ((x + m - 1) // m) * m


def _pad2d(x, rows, cols):
    return jnp.pad(x, ((0, rows - x.shape[0]), (0, cols - x.shape[1])))


def _full_spec(shape):
    n = len(shape)
    return pl.BlockSpec(shape, lambda *_: (0,) * n)


def _cost(in_arrays, out_shapes, flops, transcendentals):
    bytes_accessed = sum(int(a.size) * a.dtype.itemsize for a in in_arrays)
    bytes_accessed += sum(math.prod(s.shape) * s.dtype.itemsize for s in out_shapes)
    return pl.CostEstimate(flops=int(flops), transcendentals=int(transcendentals),
                           bytes_accessed=int(bytes_accessed))


# ----------------------------- kernels ------------------------------------ #

def _step_kernel(x_ref, wh_ref, bh_ref, *rest, use_tanh, has_out):
    """Single timestep.  x = [f_m | f_h] fused along K -> one dot gives h."""
    if has_out:
        wo_ref, bo_ref, h_ref, out_ref = rest
    else:
        (h_ref,) = rest
    h = jnp.dot(x_ref[...].astype(wh_ref.dtype), wh_ref[...],
                preferred_element_type=jnp.float32) + bh_ref[...]
    h_ref[...] = h.astype(h_ref.dtype)
    if has_out:
        o = jnp.dot(h.astype(wo_ref.dtype), wo_ref[...],
                    preferred_element_type=jnp.float32) + bo_ref[...]
        if use_tanh:
            o = jnp.tanh(o)                      # EUP; effectively free
        out_ref[...] = o.astype(out_ref.dtype)


def _scan_kernel(fh_ref, h0_ref, w_ref, bh_ref, *rest,
                 chunk, mem_p, use_tanh, has_out):
    """One grid step = `chunk` timesteps.

    The recurrent state lives in the LEFT half of a single f32 VMEM scratch
    x_state = [h | fh]; each step overwrites the right half with fh_t and
    issues ONE K-fused dot against the stacked [Wm ; Wf] weight.  The output
    head (LMN-B) is applied once per chunk on the whole h slab (off the
    serial recurrence path)."""
    if has_out:
        wo_ref, bo_ref, hseq_ref, oseq_ref, x_state = rest
    else:
        hseq_ref, x_state = rest

    @pl.when(pl.program_id(0) == 0)
    def _init():
        x_state[...] = jnp.zeros_like(x_state)
        x_state[:, :mem_p] = h0_ref[...].astype(jnp.float32)

    def body(i, carry):
        x_state[:, mem_p:] = fh_ref[i].astype(jnp.float32)
        h = jnp.dot(x_state[...].astype(w_ref.dtype), w_ref[...],
                    preferred_element_type=jnp.float32) + bh_ref[...]
        x_state[:, :mem_p] = h                  # carry (f32) for next step
        hseq_ref[i] = h.astype(hseq_ref.dtype)  # chunk-local VMEM slab write
        return carry

    lax.fori_loop(0, chunk, body, 0, unroll=True)

    if has_out:
        tc, b_p, _ = hseq_ref.shape
        # (chunk, b_p, mem_p) -> (chunk*b_p, mem_p): trailing dims are already
        # (8,128)-tile aligned, so this reshape is layout-free.
        h_all = hseq_ref[...].astype(jnp.float32).reshape(tc * b_p, mem_p)
        o = jnp.dot(h_all.astype(wo_ref.dtype), wo_ref[...],
                    preferred_element_type=jnp.float32) + bo_ref[...]
        if use_tanh:
            o = jnp.tanh(o)
        oseq_ref[...] = o.reshape(tc, b_p, -1).astype(oseq_ref.dtype)


# --------------------------- parameter packing ----------------------------- #

def init_params(key, memory_size, functional_size, prev_mem_size=0, output_size=None,
                dtype=jnp.float32):
    """Deterministic init mirroring nn.Linear's U(-1/sqrt(in), 1/sqrt(in))."""
    input_size_m = memory_size + prev_mem_size
    ks = jax.random.split(key, 6)

    def lin(kw, kb, in_f, out_f):
        bound = 1.0 / jnp.sqrt(jnp.asarray(in_f, dtype))
        w = jax.random.uniform(kw, (in_f, out_f), dtype, -bound, bound)
        b = jax.random.uniform(kb, (1, out_f), dtype, -bound, bound)
        return w, b

    wm, bm = lin(ks[0], ks[1], input_size_m, memory_size)
    wf, bf = lin(ks[2], ks[3], functional_size, memory_size)
    params = {"wm": wm, "bm": bm, "wf": wf, "bf": bf}
    if output_size is not None:
        wo, bo = lin(ks[4], ks[5], memory_size, output_size)
        params.update({"wo": wo, "bo": bo})
    return params


def pack_params(params, *, weight_dtype=None):
    """One-time packing: stack [Wm;Wf], pre-sum biases, zero-pad lane dims to 128.

    weight_dtype=jnp.bfloat16 is only worthwhile once mem_p >= ~512 (MXU-pass /
    VMEM bound); at small sizes keep f32 (default) — the per-step state cast
    would sit on the serial recurrence path for no MXU benefit."""
    wm, bm, wf, bf = params["wm"], params["bm"], params["wf"], params["bf"]
    km, mem = wm.shape
    kf = wf.shape[0]
    mem_p = _ceil_to(mem, _LANE)
    km_p = _ceil_to(km, _LANE)
    kf_p = _ceil_to(kf, _LANE)
    wdt = weight_dtype if weight_dtype is not None else wm.dtype
    packed = {
        "mem": mem, "mem_p": mem_p, "km": km, "km_p": km_p, "kf": kf, "kf_p": kf_p,
        # K-fused weight: rows [0,km_p) = Wm (zero-padded), rows [km_p,·) = Wf.
        # Used both by the single-step kernel and (when km == mem) by the scan.
        "w_fused": jnp.concatenate(
            [_pad2d(wm, km_p, mem_p), _pad2d(wf, kf_p, mem_p)], axis=0).astype(wdt),
        "b_h": _pad2d(bm + bf, 1, mem_p).astype(jnp.float32),
        "has_out": False,
    }
    if "wo" in params:
        wo, bo = params["wo"], params["bo"]
        out = wo.shape[1]
        out_p = _ceil_to(out, _LANE)
        packed.update({
            "out": out, "out_p": out_p,
            "wo": _pad2d(wo, mem_p, out_p).astype(wdt),
            "bo": _pad2d(bo, 1, out_p).astype(jnp.float32),
            "has_out": True,
        })
    return packed


# ------------------------------ wrappers ----------------------------------- #

def memory_module_step(f_h, f_m, packed, *, out_activation=None):
    """Exact MemoryModule.forward (single step).  Returns (h, out-or-None).

    Launch-overhead dominated; use memory_module_scan for recurrent work."""
    batch = f_h.shape[0]
    b_p = _ceil_to(max(batch, _SUBLANE), _SUBLANE)
    km, kf = packed["km"], packed["kf"]
    km_p, kf_p, mem_p = packed["km_p"], packed["kf_p"], packed["mem_p"]
    has_out = packed["has_out"]
    use_tanh = out_activation == "tanh"
    # TODO(synk): arbitrary python callables for out_activation are not supported
    # in-kernel; only None / "tanh" are implemented here.

    # Fused, padded input [f_m | f_h] matching the stacked-weight layout.
    x = jnp.zeros((b_p, km_p + kf_p), f_h.dtype)
    x = x.at[:batch, :km].set(f_m)
    x = x.at[:batch, km_p:km_p + kf].set(f_h)

    in_arrays = [x, packed["w_fused"], packed["b_h"]]
    in_specs = [_full_spec(a.shape) for a in in_arrays]
    out_shapes = [jax.ShapeDtypeStruct((b_p, mem_p), f_h.dtype)]
    out_specs = [_full_spec((b_p, mem_p))]
    flops = 2 * b_p * (km_p + kf_p) * mem_p
    transc = 0
    if has_out:
        out_p = packed["out_p"]
        in_arrays += [packed["wo"], packed["bo"]]
        in_specs += [_full_spec(packed["wo"].shape), _full_spec(packed["bo"].shape)]
        out_shapes.append(jax.ShapeDtypeStruct((b_p, out_p), f_h.dtype))
        out_specs.append(_full_spec((b_p, out_p)))
        flops += 2 * b_p * mem_p * out_p
        transc = b_p * out_p if use_tanh else 0

    kernel = functools.partial(_step_kernel, use_tanh=use_tanh, has_out=has_out)
    res = pl.pallas_call(
        kernel,
        out_shape=tuple(out_shapes),
        grid=(),
        in_specs=in_specs,
        out_specs=tuple(out_specs),
        cost_estimate=_cost(in_arrays, out_shapes, flops, transc),
    )(*in_arrays)
    h = res[0][:batch, :packed["mem"]]
    out = res[1][:batch, :packed["out"]] if has_out else None
    return h, out


def memory_module_scan(f_h_seq, h0, packed, *, out_activation=None, chunk=8):
    """Run the memory recurrence for a whole sequence inside ONE pallas_call.

    f_h_seq: (T, batch, functional_size) per-step functional activations.
    h0:      (batch, memory_size) initial memory state.
    chunk:   timesteps processed per grid step (amortizes pipeline overhead).
    Returns (h_seq, out_seq-or-None) with shapes (T, batch, mem) / (T, batch, out).

    NOTE: requires prev_mem_size == 0 (km == mem); the augmented multi-module
    path must fall back to memory_module_step per timestep."""
    T, batch, kf = f_h_seq.shape
    assert packed["km"] == packed["mem"], \
        "in-kernel time loop requires prev_mem_size == 0"
    b_p = _ceil_to(max(batch, _SUBLANE), _SUBLANE)
    kf_p, mem_p = packed["kf_p"], packed["mem_p"]
    has_out = packed["has_out"]
    use_tanh = out_activation == "tanh"

    chunk = int(max(1, min(chunk, T)))
    T_p = _ceil_to(T, chunk)
    n_chunks = T_p // chunk

    # TODO(synk): callers that reuse the same sequence should pre-pad once and
    # pass the padded slab directly; this pad is one small XLA op per call.
    fh_p = jnp.pad(f_h_seq, ((0, T_p - T), (0, b_p - batch), (0, kf_p - kf)))
    h0_p = _pad2d(h0.astype(jnp.float32), b_p, mem_p)

    in_arrays = [fh_p, h0_p, packed["w_fused"], packed["b_h"]]
    in_specs = [
        pl.BlockSpec((chunk, b_p, kf_p), lambda t: (t, 0, 0)),
        pl.BlockSpec((b_p, mem_p), lambda t: (0, 0)),          # read once (t==0)
        pl.BlockSpec(packed["w_fused"].shape, lambda t: (0, 0)),  # VMEM resident
        pl.BlockSpec(packed["b_h"].shape, lambda t: (0, 0)),      # VMEM resident
    ]
    out_shapes = [jax.ShapeDtypeStruct((T_p, b_p, mem_p), f_h_seq.dtype)]
    out_specs = [pl.BlockSpec((chunk, b_p, mem_p), lambda t: (t, 0, 0))]
    flops = T_p * 2 * b_p * (mem_p + kf_p) * mem_p
    transc = 0
    if has_out:
        out_p = packed["out_p"]
        in_arrays += [packed["wo"], packed["bo"]]
        in_specs += [pl.BlockSpec(packed["wo"].shape, lambda t: (0, 0)),
                     pl.BlockSpec(packed["bo"].shape, lambda t: (0, 0))]
        out_shapes.append(jax.ShapeDtypeStruct((T_p, b_p, out_p), f_h_seq.dtype))
        out_specs.append(pl.BlockSpec((chunk, b_p, out_p), lambda t: (t, 0, 0)))
        flops += T_p * 2 * b_p * mem_p * out_p
        transc = T_p * b_p * out_p if use_tanh else 0

    kernel = functools.partial(_scan_kernel, chunk=chunk, mem_p=mem_p,
                               use_tanh=use_tanh, has_out=has_out)
    res = pl.pallas_call(
        kernel,
        out_shape=tuple(out_shapes),
        grid=(n_chunks,),
        in_specs=in_specs,
        out_specs=tuple(out_specs),
        # Fused [h | fh] f32 state, carried across grid steps.
        scratch_shapes=[pltpu.VMEM((b_p, mem_p + kf_p), jnp.float32)],
        compiler_params=pltpu.CompilerParams(
            # time-chunk axis carries the recurrence -> sequential.
            dimension_semantics=("arbitrary",)),
        cost_estimate=_cost(in_arrays, out_shapes, flops, transc),
    )(*in_arrays)
    h_seq = res[0][:T, :batch, :packed["mem"]]
    out_seq = res[1][:T, :batch, :packed["out"]] if has_out else None
    return h_seq, out_seq


# ------------------------------ main --------------------------------------- #

if __name__ == "__main__":
    key = jax.random.PRNGKey(0)

    batch = 2
    memory_size = 32
    functional_size = 32
    output_size = 16
    T = 16

    k1, k2, k3, k4 = jax.random.split(key, 4)
    f_h = jax.random.normal(k1, (batch, functional_size), jnp.float32)
    f_m = jax.random.normal(k2, (batch, memory_size), jnp.float32)
    params = init_params(k3, memory_size, functional_size, 0, output_size)

    packed_b = pack_params(params)                                        # LMN-B
    packed_a = pack_params({k: params[k] for k in ("wm", "bm", "wf", "bf")})  # LMN-A

    # -------- single step (exact MemoryModule.forward semantics) ----------
    h, out = memory_module_step(f_h, f_m, packed_b, out_activation="tanh")
    h_a, out_a = memory_module_step(f_h, f_m, packed_a)
    jax.block_until_ready((h, out, h_a))
    assert out_a is None

    m_ref = f_m @ params["wm"] + params["bm"]
    f_ref = f_h @ params["wf"] + params["bf"]
    h_ref = m_ref + f_ref
    out_ref = jnp.tanh(h_ref @ params["wo"] + params["bo"])
    assert jnp.allclose(h, h_ref, atol=1e-4), "h mismatch"
    assert jnp.allclose(out, out_ref, atol=1e-4), "out mismatch"
    assert jnp.allclose(h_a, h_ref, atol=1e-4), "h (LMN-A) mismatch"

    # -------- chunked in-kernel time loop (recurrent scan), f32 weights ----
    f_h_seq = jax.random.normal(k4, (T, batch, functional_size), jnp.float32)
    h0 = jnp.zeros((batch, memory_size), jnp.float32)
    h_seq, out_seq = memory_module_scan(f_h_seq, h0, packed_b,
                                        out_activation="tanh", chunk=8)
    jax.block_until_ready((h_seq, out_seq))

    def ref_step(hc, fh_t):
        hn = (hc @ params["wm"] + params["bm"]) + (fh_t @ params["wf"] + params["bf"])
        o = jnp.tanh(hn @ params["wo"] + params["bo"])
        return hn, (hn, o)

    _, (h_seq_ref, out_seq_ref) = jax.lax.scan(ref_step, h0, f_h_seq)
    assert jnp.allclose(h_seq, h_seq_ref, atol=5e-3), "scan h mismatch"
    assert jnp.allclose(out_seq, out_seq_ref, atol=5e-3), "scan out mismatch"

    # -------- non-divisible T / different chunking still exact -------------
    h_seq2, out_seq2 = memory_module_scan(f_h_seq[:13], h0, packed_b,
                                          out_activation="tanh", chunk=4)
    jax.block_until_ready((h_seq2, out_seq2))
    assert jnp.allclose(h_seq2, h_seq_ref[:13], atol=5e-3), "chunked h mismatch"
    assert jnp.allclose(out_seq2, out_seq_ref[:13], atol=5e-3), "chunked out mismatch"

    print("KERNEL_OK")
</pallas_src>

<mosaic_0001>
module attributes {stable_mosaic.version = 11 : i64} {
  func.func @_step_kernel(%arg0: memref<8x256xf32, #tpu.memory_space<vmem>>, %arg1: memref<256x128xf32, #tpu.memory_space<vmem>>, %arg2: memref<1x128xf32, #tpu.memory_space<vmem>>, %arg3: memref<128x128xf32, #tpu.memory_space<vmem>>, %arg4: memref<1x128xf32, #tpu.memory_space<vmem>>, %arg5: memref<8x128xf32, #tpu.memory_space<vmem>>, %arg6: memref<8x128xf32, #tpu.memory_space<vmem>>) attributes {dimension_semantics = [], scalar_prefetch = 0 : i64, scratch_operands = 0 : i64, tpu.core_type = #tpu.core_type<tc>} {
    %c0 = arith.constant 0 : index
    %c0_0 = arith.constant 0 : index
    %0 = vector.load %arg0[%c0, %c0_0] : memref<8x256xf32, #tpu.memory_space<vmem>>, vector<8x256xf32>
    %c0_1 = arith.constant 0 : index
    %c0_2 = arith.constant 0 : index
    %1 = vector.load %arg1[%c0_1, %c0_2] : memref<256x128xf32, #tpu.memory_space<vmem>>, vector<256x128xf32>
    %cst = arith.constant dense<0.000000e+00> : vector<8x128xf32>
    %2 = tpu.matmul %0, %1, %cst {dimension_numbers = #tpu.dot_dimension_numbers<[1], [0], [0], [1], [0, 0, 1, 1], [], []>} : vector<8x256xf32>, vector<256x128xf32>, vector<8x128xf32> -> vector<8x128xf32>
    %c0_3 = arith.constant 0 : index
    %c0_4 = arith.constant 0 : index
    %3 = vector.load %arg2[%c0_3, %c0_4] : memref<1x128xf32, #tpu.memory_space<vmem>>, vector<1x128xf32>
    %4 = vector.broadcast %3 : vector<1x128xf32> to vector<8x128xf32>
    %5 = arith.addf %2, %4 : vector<8x128xf32>
    %c0_5 = arith.constant 0 : index
    %c0_6 = arith.constant 0 : index
    %6 = vector.load %arg5[%c0_5, %c0_6] : memref<8x128xf32, #tpu.memory_space<vmem>>, vector<8x128xf32>
    tpu.vector_store %arg5[%c0_5, %c0_6], %5 {strides = array<i32>} : memref<8x128xf32, #tpu.memory_space<vmem>>, vector<8x128xf32>,
    %c0_7 = arith.constant 0 : index
    %c0_8 = arith.constant 0 : index
    %7 = vector.load %arg3[%c0_7, %c0_8] : memref<128x128xf32, #tpu.memory_space<vmem>>, vector<128x128xf32>
    %cst_9 = arith.constant dense<0.000000e+00> : vector<8x128xf32>
    %8 = tpu.matmul %5, %7, %cst_9 {dimension_numbers = #tpu.dot_dimension_numbers<[1], [0], [0], [1], [0, 0, 1, 1], [], []>} : vector<8x128xf32>, vector<128x128xf32>, vector<8x128xf32> -> vector<8x128xf32>
    %c0_10 = arith.constant 0 : index
    %c0_11 = arith.constant 0 : index
    %9 = vector.load %arg4[%c0_10, %c0_11] : memref<1x128xf32, #tpu.memory_space<vmem>>, vector<1x128xf32>
    %10 = vector.broadcast %9 : vector<1x128xf32> to vector<8x128xf32>
    %11 = arith.addf %8, %10 : vector<8x128xf32>
    %12 = math.tanh %11 : vector<8x128xf32>
    %c0_12 = arith.constant 0 : index
    %c0_13 = arith.constant 0 : index
    %13 = vector.load %arg6[%c0_12, %c0_13] : memref<8x128xf32, #tpu.memory_space<vmem>>, vector<8x128xf32>
    tpu.vector_store %arg6[%c0_12, %c0_13], %12 {strides = array<i32>} : memref<8x128xf32, #tpu.memory_space<vmem>>, vector<8x128xf32>,
    return
  }
}

</mosaic_0001>

<bundles_post_ra>
// kernel: tpu_custom_call.1
= control target key start
LH: loop header
LB: loop body
LE: loop exit
PB: predicated region body
PF: predicated region fallthrough
CT: control target
= control target key end

     0   :  { %12 = vsyncpa [#allocation3], 0  ;;  %s700_s0 = inlined_call_operand.hbm [shape: f32[8,256], index: 0, kind: input, shape index: {}]   ;;  %s701_s1 = inlined_call_operand.hbm [shape: f32[256,128], index: 1, kind: input, shape index: {}]   ;;  %s702_s2 = inlined_call_operand.vmem [shape: f32[1,128], index: 2, kind: input, shape index: {}]   ;;  %s703_s3 = inlined_call_operand.hbm [shape: f32[128,128], index: 3, kind: input, shape index: {}]   ;;  %s704_s4 = inlined_call_operand.vmem [shape: f32[1,128], index: 4, kind: input, shape index: {}]   ;;  %s705_s5 = inlined_call_operand.hbm [shape: f32[8,128], index: 5, kind: output, shape index: {0}]   ;;  %s706_s6 = inlined_call_operand.hbm [shape: f32[8,128], index: 6, kind: output, shape index: {1}]  }
   0x1   :  { %13 = vsyncpa [#allocation6], 0 }
   0x2   :  { %14 = vsyncpa [#allocation4], 0 }
   0x3   :  { %15 = vsyncpa [#allocation10], 0  ;;  %s575_s21 = smov [#allocation5]   ;;  %s457_s25 = scalar_lea.hbm %s701_s1, 4096 }
   0x4   :  { %s31_s22 = sshll.u32 %s575_s21, 4  ;;  %p458_p0 = scmp.ne.s32.totalorder %s701_s1, %s457_s25  ;;  %s32_s22 = int_to_ptr.vmem [resolvable:$true] %s31_s22 }
   0x5   :  { %p461_p1 = scmp.lt.u32.totalorder %s457_s25, %s701_s1 }
   0x7   :  { %p463_p2 = pnand %p461_p1, %p458_p0 }
   0x9   :  { %466 = shalt.err (!%p463_p2)
}
   0xa   :  { %s467_s30 = scalar_lea.vmem %s32_s22, 4096  ;;  %p472_p4 = scmp.lt.s32.totalorder %s32_s22, %s32_s22 }
   0xb   :  { %p468_p3 = scmp.ne.s32.totalorder %s32_s22, %s467_s30  ;;  %p473_p5 = scmp.lt.s32.totalorder %s467_s30, %s467_s30 }
   0xd   :  { %p474_p6 = por %p473_p5, %p472_p4 }
   0xf   :  { %p475_p7 = pnand %p474_p6, %p468_p3 }
  0x11   :  { %478 = shalt.err (!%p475_p7)
}
  0x12   :  { %s576_s7 = smov 128   ;;  %s577_s8 = smov 8  }
  0x13   :  { %37 = dma.hbm_to_vmem [thread:$0]  %s701_s1, 4096, %s32_s22, [#allocation6], %s576_s7, %s576_s7, %s577_s8  }
  0x14   :  { %s578_s11 = smov [#allocation2]   ;;  %s579_s13 = smov [#allocation7]  }
  0x15   :  { %s22_s12 = sshll.u32 %s578_s11, 4  ;;  %s45_s14 = sshll.u32 %s579_s13, 4  ;;  %s23_s12 = int_to_ptr.vmem [resolvable:$true] %s22_s12  ;;  %s46_s14 = int_to_ptr.vmem [resolvable:$true] %s45_s14 }
  0x16   :  { %s479_s17 = scalar_lea.hbm %s700_s0, 256 }
  0x17   :  { %p480_p8 = scmp.ne.s32.totalorder %s700_s0, %s479_s17  ;;  %p483_p9 = scmp.lt.u32.totalorder %s479_s17, %s700_s0 }
  0x19   :  { %p485_p10 = pnand %p483_p9, %p480_p8 }
  0x1b   :  { %488 = shalt.err (!%p485_p10)
}
  0x1c   :  { %s489_s1 = scalar_lea.vmem %s23_s12, 256  ;;  %p494_p12 = scmp.lt.s32.totalorder %s23_s12, %s23_s12 }
  0x1d   :  { %p490_p11 = scmp.ne.s32.totalorder %s23_s12, %s489_s1  ;;  %p495_p13 = scmp.lt.s32.totalorder %s489_s1, %s489_s1 }
  0x1f   :  { %p496_p0 = por %p495_p13, %p494_p12 }
  0x21   :  { %p497_p1 = pnand %p496_p0, %p490_p11 }
  0x23   :  { %500 = shalt.err (!%p497_p1)
}
  0x24   :  { %25 = dma.hbm_to_vmem [thread:$0]  %s700_s0, 256, %s23_s12, [#allocation3]  }
  0x25   :  { %s501_s26 = scalar_lea.hbm %s703_s3, 2048 }
  0x26   :  { %p502_p2 = scmp.ne.s32.totalorder %s703_s3, %s501_s26  ;;  %p505_p3 = scmp.lt.u32.totalorder %s501_s26, %s703_s3 }
  0x28   :  { %p507_p4 = pnand %p505_p3, %p502_p2 }
  0x2a   :  { %510 = shalt.err (!%p507_p4)
}
  0x2b   :  { %s511_s9 = scalar_lea.vmem %s46_s14, 2048  ;;  %p516_p6 = scmp.lt.s32.totalorder %s46_s14, %s46_s14 }
  0x2c   :  { %p512_p5 = scmp.ne.s32.totalorder %s46_s14, %s511_s9  ;;  %p517_p7 = scmp.lt.s32.totalorder %s511_s9, %s511_s9 }
  0x2e   :  { %p518_p8 = por %p517_p7, %p516_p6 }
  0x30   :  { %p519_p9 = pnand %p518_p8, %p512_p5 }
  0x32   :  { %522 = shalt.err (!%p519_p9)
}
  0x33   :  { %51 = dma.hbm_to_vmem [thread:$0]  %s703_s3, 2048, %s46_s14, [#allocation6], %s576_s7, %s576_s7, %s577_s8  }
  0x34   :  { %567 = dma.done.wait [#allocation3], 256  }
  0x35   :  { %568 = vsyncadd [#allocation3], 4294967040 }
  0x36   :  { %569 = dma.done.wait [#allocation6], 6144  }
  0x37   :  { %570 = vsyncadd [#allocation6], 4294961152  ;;  %v580_v0 = vmov 0.0|0.0   ;;  %v81_v1 = vld [vmem:[#allocation5 + $0x80] sm:$0xff]  ;;  %v82_v2 = vld [vmem:[#allocation5 + $0x88] sm:$0xff]  ;;  %vm581_vm0 = vmmov 0  }
  0x38   :  { %421 = vmatprep.subr.bf16.mxu1 %v580_v0  ;;  %v65_v3 = vld [vmem:[#allocation5] sm:$0xff]  ;;  %v389_v4 = vpack.c.bf16 %v82_v2, %v81_v1  ;;  %v66_v5 = vld [vmem:[#allocation5 + $0x8] sm:$0xff]  ;;  %v83_v6 = vld [vmem:[#allocation5 + $0x90] sm:$0xff]  ;;  %s583_s8 = smov [#allocation8]  }
  0x39   :  { %v84_v7 = vld [vmem:[#allocation5 + $0x98] sm:$0xff]  ;;  %v391_v8 = vpack.c.bf16 %v66_v5, %v65_v3  ;;  %v67_v10 = vld [vmem:[#allocation5 + $0x10] sm:$0xff]  ;;  %v85_v12 = vld [vmem:[#allocation5 + $0xa0] sm:$0xff]  ;;  %s276_s11 = sshll.u32 %s583_s8, 4  ;;  %s277_s11 = int_to_ptr.vmem [resolvable:$true] %s276_s11 }
  0x3a   :  { %v393_v9 = vpack.c.bf16 %v84_v7, %v83_v6  ;;  %v68_v11 = vld [vmem:[#allocation5 + $0x18] sm:$0xff]  ;;  %390 = vmatprep.subr.bf16.mxu0 %v389_v4  ;;  %v86_v13 = vld [vmem:[#allocation5 + $0xa8] sm:$0xff]  ;;  %v69_v16 = vld [vmem:[#allocation5 + $0x20] sm:$0xff]  ;;  %s523_s12 = scalar_lea.vmem %s277_s11, 128  ;;  %p528_p11 = scmp.lt.s32.totalorder %s277_s11, %s277_s11 }
  0x3b   :  { %392 = vmatpush3.bf16.msra.mxu0 %v391_v8  ;;  %v395_v14 = vpack.c.bf16 %v68_v11, %v67_v10  ;;  %v397_v15 = vpack.c.bf16 %v86_v13, %v85_v12  ;;  %v70_v17 = vld [vmem:[#allocation5 + $0x28] sm:$0xff]  ;;  %v87_v18 = vld [vmem:[#allocation5 + $0xb0] sm:$0xff]  ;;  %v88_v19 = vld [vmem:[#allocation5 + $0xb8] sm:$0xff]  ;;  %v582_v12 = vmov 0.0   ;;  %p524_p10 = scmp.ne.s32.totalorder %s277_s11, %s523_s12  ;;  %p529_p12 = scmp.lt.s32.totalorder %s523_s12, %s523_s12 }
  0x3c   :  { %394 = vmatprep.subr.bf16.mxu0 %v393_v9  ;;  %v399_v20 = vpack.c.bf16 %v70_v17, %v69_v16  ;;  %v401_v21 = vpack.c.bf16 %v88_v19, %v87_v18  ;;  %v71_v22 = vld [vmem:[#allocation5 + $0x30] sm:$0xff]  ;;  %v72_v23 = vld [vmem:[#allocation5 + $0x38] sm:$0xff]  ;;  %v89_v24 = vld [vmem:[#allocation5 + $0xc0] sm:$0xff]  ;;  %386 = vmatprep.mubr.msk.f32.mxu1 %vm581_vm0, %v582_v12 }
  0x3d   :  { %v90_v25 = vld [vmem:[#allocation5 + $0xc8] sm:$0xff]  ;;  %v64_v26 = vld [vmem:[#allocation2 + $0x8] sm:$0xff]  ;;  %v175_v27 = vld [vmem:[#allocation7] sm:$0xff]  ;;  %v403_v29 = vpack.c.bf16 %v72_v23, %v71_v22  ;;  %p530_p13 = por %p529_p12, %p528_p11 }
  0x3e   :  { %168 = vmatprep.mubr.f32.mxu0 %v64_v26  ;;  %v176_v28 = vld [vmem:[#allocation7 + $0x8] sm:$0xff]  ;;  %v177_v31 = vld [vmem:[#allocation7 + $0x10] sm:$0xff]  ;;  %v178_v32 = vld [vmem:[#allocation7 + $0x18] sm:$0xff]  ;;  %v405_v33 = vpack.c.bf16 %v90_v25, %v89_v24 }
  0x3f   :  { %396 = vmatpush3.bf16.msra.mxu0 %v395_v14  ;;  %v422_v30 = vpack.c.bf16 %v176_v28, %v175_v27  ;;  %v73_v34 = vld [vmem:[#allocation5 + $0x40] sm:$0xff]  ;;  %v74_v35 = vld [vmem:[#allocation5 + $0x48] sm:$0xff]  ;;  %v91_v36 = vld [vmem:[#allocation5 + $0xd0] sm:$0xff]  ;;  %v425_v38 = vpack.c.bf16 %v178_v32, %v177_v31  ;;  %p531_p0 = pnand %p530_p13, %p524_p10 }
  0x40   :  { %398 = vmatprep.subr.bf16.mxu0 %v397_v15  ;;  %v92_v37 = vld [vmem:[#allocation5 + $0xd8] sm:$0xff]  ;;  %v179_v39 = vld [vmem:[#allocation7 + $0x20] sm:$0xff]  ;;  %v180_v40 = vld [vmem:[#allocation7 + $0x28] sm:$0xff]  ;;  %v407_v41 = vpack.c.bf16 %v74_v35, %v73_v34 }
  0x41   :  { %423 = vmatpush3.bf16.msra.mxu1 %v422_v30  ;;  %v409_v42 = vpack.c.bf16 %v92_v37, %v91_v36  ;;  %v75_v43 = vld [vmem:[#allocation5 + $0x50] sm:$0xff]  ;;  %v76_v44 = vld [vmem:[#allocation5 + $0x58] sm:$0xff]  ;;  %v93_v45 = vld [vmem:[#allocation5 + $0xe0] sm:$0xff]  ;;  %v428_v47 = vpack.c.bf16 %v180_v40, %v179_v39 }
  0x42   :  { %424 = vmatprep.subr.bf16.mxu1 %v580_v0  ;;  %v94_v46 = vld [vmem:[#allocation5 + $0xe8] sm:$0xff]  ;;  %v181_v48 = vld [vmem:[#allocation7 + $0x30] sm:$0xff]  ;;  %v182_v49 = vld [vmem:[#allocation7 + $0x38] sm:$0xff]  ;;  %v411_v50 = vpack.c.bf16 %v76_v44, %v75_v43 }
  0x43   :  { %400 = vmatpush3.bf16.msra.mxu0 %v399_v20  ;;  %v413_v51 = vpack.c.bf16 %v94_v46, %v93_v45  ;;  %v77_v52 = vld [vmem:[#allocation5 + $0x60] sm:$0xff]  ;;  %v78_v53 = vld [vmem:[#allocation5 + $0x68] sm:$0xff]  ;;  %v95_v54 = vld [vmem:[#allocation5 + $0xf0] sm:$0xff]  ;;  %v431_v56 = vpack.c.bf16 %v182_v49, %v181_v48 }
  0x44   :  { %402 = vmatprep.subr.bf16.mxu0 %v401_v21  ;;  %v96_v55 = vld [vmem:[#allocation5 + $0xf8] sm:$0xff]  ;;  %v183_v57 = vld [vmem:[#allocation7 + $0x40] sm:$0xff]  ;;  %v184_v58 = vld [vmem:[#allocation7 + $0x48] sm:$0xff]  ;;  %v415_v59 = vpack.c.bf16 %v78_v53, %v77_v52 }
  0x45   :  { %426 = vmatpush3.bf16.msra.mxu1 %v425_v38  ;;  %v417_v60 = vpack.c.bf16 %v96_v55, %v95_v54  ;;  %v79_v61 = vld [vmem:[#allocation5 + $0x70] sm:$0xff]  ;;  %v80_v62 = vld [vmem:[#allocation5 + $0x78] sm:$0xff]  ;;  %v434_v63 = vpack.c.bf16 %v184_v58, %v183_v57  ;;  %v187_v5 = vld [vmem:[#allocation7 + $0x60] sm:$0xff] }
  0x46   :  { %427 = vmatprep.subr.bf16.mxu1 %v580_v0  ;;  %v185_v1 = vld [vmem:[#allocation7 + $0x50] sm:$0xff]  ;;  %v186_v2 = vld [vmem:[#allocation7 + $0x58] sm:$0xff]  ;;  %v419_v3 = vpack.c.bf16 %v80_v62, %v79_v61  ;;  %v188_v6 = vld [vmem:[#allocation7 + $0x68] sm:$0xff] }
  0x47   :  { %404 = vmatpush3.bf16.msra.mxu0 %v403_v29  ;;  %v437_v4 = vpack.c.bf16 %v186_v2, %v185_v1  ;;  %v63_v7 = vld [vmem:[#allocation2] sm:$0xff]  ;;  %v440_v8 = vpack.c.bf16 %v188_v6, %v187_v5  ;;  %v190_v10 = vld [vmem:[#allocation7 + $0x78] sm:$0xff] }
  0x48   :  { %406 = vmatprep.subr.bf16.mxu0 %v405_v33  ;;  %v189_v9 = vld [vmem:[#allocation7 + $0x70] sm:$0xff] }
  0x49   :  { %429 = vmatpush3.bf16.msra.mxu1 %v428_v47  ;;  %v443_v11 = vpack.c.bf16 %v190_v10, %v189_v9  ;;  %v300_v14 = vld [vmem:[%s702_s2] ss:$0 sm:$0xff] }
  0x4a   :  { %430 = vmatprep.subr.bf16.mxu1 %v580_v0 }
  0x4b   :  { %408 = vmatpush3.bf16.msra.mxu0 %v407_v41 }
  0x4c   :  { %410 = vmatprep.subr.bf16.mxu0 %v409_v42 }
  0x4d   :  { %432 = vmatpush3.bf16.msra.mxu1 %v431_v56 }
  0x4e   :  { %433 = vmatprep.subr.bf16.mxu1 %v580_v0 }
  0x4f   :  { %412 = vmatpush3.bf16.msra.mxu0 %v411_v50 }
  0x50   :  { %414 = vmatprep.subr.bf16.mxu0 %v413_v51 }
  0x51   :  { %435 = vmatpush3.bf16.msra.mxu1 %v434_v63 }
  0x52   :  { %436 = vmatprep.subr.bf16.mxu1 %v580_v0 }
  0x53   :  { %416 = vmatpush3.bf16.msra.mxu0 %v415_v59 }
  0x54   :  { %418 = vmatprep.subr.bf16.mxu0 %v417_v60 }
  0x55   :  { %438 = vmatpush3.bf16.msra.mxu1 %v437_v4 }
  0x56   :  { %439 = vmatprep.subr.bf16.mxu1 %v580_v0 }
  0x57   :  { %420 = vmatpush3.bf16.msra.mxu0 %v419_v3 }
  0x59   :  { %441 = vmatpush3.bf16.msra.mxu1 %v440_v8 }
  0x5a   :  { %169 = vmatmul.mubr.f32.vlgmr.msra.gmra.mrb[0].mxu0 %v63_v7  ;;  %442 = vmatprep.subr.bf16.mxu1 %v580_v0 }
  0x5d   :  { %444 = vmatpush3.bf16.msra.mxu1 %v443_v11 }
 0x12d   :  { %v334_v13 = vpop.f32.mrb[0].mxu0 }
 0x12e   :  { %v335_v15 = vpop.f32.mrb[1].mxu0 }
 0x12f   :  { %v336_v16 = vadd.f32 %v335_v15, %v334_v13 }
 0x131   :  { %v171_v17 = vadd.f32 %v336_v16, %v300_v14 }
 0x133   :  { %174 = vst [vmem:[#allocation8] sm:$0xff] %v171_v17  ;;  %387 = vmatmul.mubr.f32.vlgmr.msra.gmra.mrb[0].mxu1 %v171_v17 }
 0x134   :  { %534 = shalt.err (!%p531_p0)
}
 0x135   :  { %s535_s15 = scalar_lea.hbm %s705_s5, 128 }
 0x136   :  { %p536_p1 = scmp.ne.s32.totalorder %s705_s5, %s535_s15  ;;  %p539_p2 = scmp.lt.u32.totalorder %s535_s15, %s705_s5 }
 0x138   :  { %p541_p3 = pnand %p539_p2, %p536_p1 }
 0x13a   :  { %544 = shalt.err (!%p541_p3)
}
 0x13b   :  { %279 = dma.vmem_to_hbm [thread:$0]  %s277_s11, 128, %s705_s5, [#allocation4]   ;;  %v301_v0 = vld [vmem:[%s704_s4] ss:$0 sm:$0xff] }
 0x13c   :  { %s584_s22 = smov [#allocation9]  }
 0x13d   :  { %s286_s23 = sshll.u32 %s584_s22, 4  ;;  %s287_s23 = int_to_ptr.vmem [resolvable:$true] %s286_s23 }
 0x13e   :  { %s545_s24 = scalar_lea.vmem %s287_s23, 128  ;;  %p550_p5 = scmp.lt.s32.totalorder %s287_s23, %s287_s23 }
 0x13f   :  { %p546_p4 = scmp.ne.s32.totalorder %s287_s23, %s545_s24  ;;  %p551_p6 = scmp.lt.s32.totalorder %s545_s24, %s545_s24 }
 0x141   :  { %p552_p7 = por %p551_p6, %p550_p5 }
 0x143   :  { %p553_p8 = pnand %p552_p7, %p546_p4 }
 0x206   :  { %v264_v18 = vpop.f32.mrb[0].mxu1 }
 0x207   :  { %v265_v19 = vadd.f32 %v301_v0, %v264_v18  ;;  %v388_v20 = vpop.f32.mrb[1].mxu1 }
 0x209   :  { %455 = vtanh.f32 %v265_v19 }
 0x213   :  { %v456_v21 = vpop.eup %455 }
 0x214   :  { %269 = vst [vmem:[#allocation9] sm:$0xff] %v456_v21 }
 0x215   :  { %556 = shalt.err (!%p553_p8)
}
 0x216   :  { %s557_s4 = scalar_lea.hbm %s706_s6, 128 }
 0x217   :  { %p558_p9 = scmp.ne.s32.totalorder %s706_s6, %s557_s4  ;;  %p561_p10 = scmp.lt.u32.totalorder %s557_s4, %s706_s6 }
 0x219   :  { %p563_p11 = pnand %p561_p10, %p558_p9 }
 0x21b   :  { %566 = shalt.err (!%p563_p11)
}
 0x21c   :  { %289 = dma.vmem_to_hbm [thread:$0]  %s287_s23, 128, %s706_s6, [#allocation10]  }
 0x21d   :  { %571 = dma.done.wait [#allocation4], 128  }
 0x21e   :  { %572 = vsyncadd [#allocation4], 4294967168 }
 0x21f   :  { %573 = dma.done.wait [#allocation10], 128  }
 0x220   :  { %574 = vsyncadd [#allocation10], 4294967168 }
 0x221   :  { %296 = vsyncpa [#allocation3], 1 }
 0x222   :  { %297 = vsyncpa [#allocation6], 1 }
 0x223   :  { %298 = vsyncpa [#allocation4], 1 }
 0x224   :  { %299 = vsyncpa [#allocation10], 1 }

</bundles_post_ra>
